<compile_context>
chip_gen: v7x
topology: tpu7x:2x2x1
jax: 0.10.0
libtpu: 0.0.40
codegen_flags: <defaults>
</compile_context>

<pallas_src>
import jax
import jax.numpy as jnp
from jax.experimental import pallas as pl
from jax.experimental.pallas import tpu as pltpu

HID = 128       # 10 hidden units -> one full lane width (VMEM-resident only)
OUT_PAD = 8     # layer-3 matmul output width in-kernel; only lane 0 is stored
TILE_N = 4096   # max batch-tile rows per grid step
SUB_N = 512     # rows per inner sub-block (bounds h1/h2 to 256 KiB f32 each)
SPLIT_N = 1024  # batches larger than this (but < 2*TILE_N) split into 2 tiles


def _mlp_kernel(x_ref, w1_ref, b1_ref, w2_ref, w3_ref, o_ref):
    rows = x_ref.shape[0]
    sub = SUB_N if (rows > SUB_N and rows % SUB_N == 0) else rows

    # Resident (constant index_map) params, read once per grid step.
    w1r0 = w1_ref[0:1, :]            # [1, HID] f32
    w1r1 = w1_ref[1:2, :]            # [1, HID] f32
    b1 = b1_ref[...]                 # [1, HID] f32 (col HID-1 == 1.0)
    w2 = w2_ref[...]                 # [HID, HID] bf16 (b2 fused in row HID-1)
    w3 = w3_ref[...]                 # [HID, OUT_PAD] bf16 (b3 fused, row HID-1)

    for s in range(rows // sub):
        r0, r1 = s * sub, (s + 1) * sub
        x0 = x_ref[r0:r1, 0:1]       # [sub, 1] f32
        x1 = x_ref[r0:r1, 1:2]       # [sub, 1] f32
        # layer 1 + ReLU on the VPU (K=2; exact f32).  b1 col HID-1 == 1 makes
        # h1's last column the constant-1 feeding the fused b2 row of w2.
        h1 = jnp.maximum(x0 * w1r0 + x1 * w1r1 + b1, 0.0)
        # layer 2 + ReLU on the MXU (bf16 operands, f32 accumulation).
        h2 = jnp.dot(h1.astype(jnp.bfloat16), w2,
                     preferred_element_type=jnp.float32)
        h2 = jnp.maximum(h2, 0.0)    # col HID-1 stays exactly 1.0 (fused b3)
        # layer 3 (logits, no activation).
        h3 = jnp.dot(h2.astype(jnp.bfloat16), w3,
                     preferred_element_type=jnp.float32)
        o_ref[r0:r1, :] = h3[:, 0:1]


def _round_up(a, m):
    return ((a + m - 1) // m) * m


@jax.jit
def circle_model_v2_forward(x, params):
    """x: [N, 2] float32 -> logits [N, 1] float32 (matches PyTorch forward)."""
    w1, b1, w2, b2, w3, b3 = params
    n = x.shape[0]

    n8 = _round_up(n, 8)
    if n8 >= 2 * TILE_N:
        tile_n = TILE_N                              # many full-size tiles
    elif n8 > SPLIT_N:
        tile_n = _round_up(-(-n8 // 2), 8)           # 2 balanced tiles (v7x TCs)
    else:
        tile_n = n8                                  # single small tile
    n_pad = _round_up(n8, tile_n)
    grid = (n_pad // tile_n,)

    # Row-pad x only; it stays 2 lanes wide (block last dim == full array dim).
    x_p = jnp.pad(x.astype(jnp.float32), ((0, n_pad - n), (0, 0)))

    # Layer-1 params stay f32 (VPU path).
    w1_p = jnp.zeros((2, HID), jnp.float32).at[:, :10].set(w1.astype(jnp.float32))
    b1_p = (jnp.zeros((1, HID), jnp.float32)
            .at[0, :10].set(b1.astype(jnp.float32))
            .at[0, HID - 1].set(1.0))
    # Layer-2/3 weights in bf16 with biases fused into row HID-1;
    # w2[HID-1, HID-1] = 1 keeps h2's constant-1 column alive for fused b3.
    w2_p = (jnp.zeros((HID, HID), jnp.bfloat16)
            .at[:10, :10].set(w2.astype(jnp.bfloat16))
            .at[HID - 1, :10].set(b2.astype(jnp.bfloat16))
            .at[HID - 1, HID - 1].set(1.0))
    w3_p = (jnp.zeros((HID, OUT_PAD), jnp.bfloat16)
            .at[:10, :1].set(w3.astype(jnp.bfloat16))
            .at[HID - 1, 0].set(b3.astype(jnp.bfloat16)[0]))

    # x / out tiles stream along the grid; weights use constant index_maps so
    # they are loaded once and stay resident across all grid steps.
    x_spec = pl.BlockSpec((tile_n, 2), lambda i: (i, 0))
    o_spec = pl.BlockSpec((tile_n, 1), lambda i: (i, 0))
    const = lambda shape: pl.BlockSpec(shape, lambda i: (0, 0))

    flops = 2 * n_pad * (2 * HID + HID * HID + HID * OUT_PAD)
    bytes_accessed = (4 * n_pad * 3                       # x (2 lanes) + out (1)
                      + 4 * (2 * HID + HID)               # w1, b1 (f32)
                      + 2 * (HID * HID + HID * OUT_PAD))  # w2, w3 (bf16)

    out_p = pl.pallas_call(
        _mlp_kernel,
        out_shape=jax.ShapeDtypeStruct((n_pad, 1), jnp.float32),
        grid=grid,
        in_specs=[
            x_spec,
            const((2, HID)),         # w1 (f32, resident)
            const((1, HID)),         # b1 (f32, resident; col HID-1 == 1)
            const((HID, HID)),       # w2 (bf16, b2 fused, resident)
            const((HID, OUT_PAD)),   # w3 (bf16, b3 fused, resident)
        ],
        out_specs=o_spec,
        compiler_params=pltpu.CompilerParams(
            dimension_semantics=("parallel",),
            vmem_limit_bytes=32 * 1024 * 1024),
        cost_estimate=pl.CostEstimate(
            flops=flops, transcendentals=0, bytes_accessed=bytes_accessed),
    )(x_p, w1_p, b1_p, w2_p, w3_p)

    return out_p[:n, :]


def init_params(key):
    """Deterministic init mimicking nn.Linear (uniform +/- 1/sqrt(fan_in)).
    Weights stored as [in_features, out_features] (transposed vs PyTorch)."""
    def linear(k, fan_in, fan_out):
        kw, kb = jax.random.split(k)
        bound = 1.0 / jnp.sqrt(float(fan_in))
        w = jax.random.uniform(kw, (fan_in, fan_out), jnp.float32, -bound, bound)
        b = jax.random.uniform(kb, (fan_out,), jnp.float32, -bound, bound)
        return w, b

    k1, k2, k3 = jax.random.split(key, 3)
    w1, b1 = linear(k1, 2, 10)
    w2, b2 = linear(k2, 10, 10)
    w3, b3 = linear(k3, 10, 1)
    return (w1, b1, w2, b2, w3, b3)


def _reference(x, params):
    """Matches the kernel's numerics: exact-f32 layer 1, bf16-operand /
    f32-accumulate MXU layers 2 and 3."""
    w1, b1, w2, b2, w3, b3 = params
    x = x.astype(jnp.float32)
    h1 = jnp.maximum(x[:, 0:1] * w1[0:1, :] + x[:, 1:2] * w1[1:2, :] + b1, 0.0)
    h2 = jnp.maximum(
        jnp.dot(h1.astype(jnp.bfloat16), w2.astype(jnp.bfloat16),
                preferred_element_type=jnp.float32)
        + b2.astype(jnp.bfloat16).astype(jnp.float32), 0.0)
    return (jnp.dot(h2.astype(jnp.bfloat16), w3.astype(jnp.bfloat16),
                    preferred_element_type=jnp.float32)
            + b3.astype(jnp.bfloat16).astype(jnp.float32))


if __name__ == "__main__":
    key = jax.random.PRNGKey(0)
    k_params, k1, k2, k3 = jax.random.split(key, 4)
    params = init_params(k_params)

    # n=16   -> single small tile path
    # n=2071 -> 2 balanced tiles (v7x megacore path) with padding row tail
    # n=8200 -> TILE_N=4096 tiles + 8-step inner sub-block loop
    for k_x, n in ((k1, 16), (k2, 2071), (k3, 8200)):
        x = jax.random.normal(k_x, (n, 2), dtype=jnp.float32)
        logits = circle_model_v2_forward(x, params)
        jax.block_until_ready(logits)
        assert logits.shape == (n, 1)
        ref = _reference(x, params)
        assert jnp.allclose(logits, ref, atol=1e-2, rtol=1e-2), (
            n, float(jnp.max(jnp.abs(logits - ref))))

    print("KERNEL_OK")
</pallas_src>

<mosaic_0001>
module attributes {stable_mosaic.version = 11 : i64} {
  func.func @_mlp_kernel(%arg0: i32, %arg1: memref<16x2xf32, #tpu.memory_space<vmem>>, %arg2: memref<2x128xf32, #tpu.memory_space<vmem>>, %arg3: memref<1x128xf32, #tpu.memory_space<vmem>>, %arg4: memref<128x128xbf16, #tpu.memory_space<vmem>>, %arg5: memref<128x8xbf16, #tpu.memory_space<vmem>>, %arg6: memref<16x1xf32, #tpu.memory_space<vmem>>) attributes {dimension_semantics = [#tpu.dimension_semantics<parallel>], iteration_bounds = array<i64: 1>, scalar_prefetch = 0 : i64, scratch_operands = 0 : i64, tpu.core_type = #tpu.core_type<tc>, window_params = [{transform_indices = @transform_0, window_bounds = array<i64: 16, 2>}, {pipeline_mode = #tpu.pipeline_mode<synchronous>, transform_indices = @transform_1, window_bounds = array<i64: 2, 128>}, {pipeline_mode = #tpu.pipeline_mode<synchronous>, transform_indices = @transform_2, window_bounds = array<i64: 1, 128>}, {pipeline_mode = #tpu.pipeline_mode<synchronous>, transform_indices = @transform_3, window_bounds = array<i64: 128, 128>}, {pipeline_mode = #tpu.pipeline_mode<synchronous>, transform_indices = @transform_4, window_bounds = array<i64: 128, 8>}, {transform_indices = @transform_5, window_bounds = array<i64: 16, 1>}]} {
    %c0 = arith.constant 0 : index
    %c0_0 = arith.constant 0 : index
    %0 = vector.load %arg2[%c0, %c0_0] : memref<2x128xf32, #tpu.memory_space<vmem>>, vector<1x128xf32>
    %c1 = arith.constant 1 : index
    %c0_1 = arith.constant 0 : index
    %1 = vector.load %arg2[%c1, %c0_1] : memref<2x128xf32, #tpu.memory_space<vmem>>, vector<1x128xf32>
    %c0_2 = arith.constant 0 : index
    %c0_3 = arith.constant 0 : index
    %2 = vector.load %arg3[%c0_2, %c0_3] : memref<1x128xf32, #tpu.memory_space<vmem>>, vector<1x128xf32>
    %c0_4 = arith.constant 0 : index
    %c0_5 = arith.constant 0 : index
    %3 = vector.load %arg4[%c0_4, %c0_5] : memref<128x128xbf16, #tpu.memory_space<vmem>>, vector<128x128xbf16>
    %c0_6 = arith.constant 0 : index
    %c0_7 = arith.constant 0 : index
    %4 = vector.load %arg5[%c0_6, %c0_7] : memref<128x8xbf16, #tpu.memory_space<vmem>>, vector<128x8xbf16>
    %c0_8 = arith.constant 0 : index
    %c0_9 = arith.constant 0 : index
    %5 = vector.load %arg1[%c0_8, %c0_9] : memref<16x2xf32, #tpu.memory_space<vmem>>, vector<16x1xf32>
    %c0_10 = arith.constant 0 : index
    %c1_11 = arith.constant 1 : index
    %6 = vector.load %arg1[%c0_10, %c1_11] : memref<16x2xf32, #tpu.memory_space<vmem>>, vector<16x1xf32>
    %7 = vector.broadcast %5 : vector<16x1xf32> to vector<16x128xf32>
    %8 = vector.broadcast %0 : vector<1x128xf32> to vector<16x128xf32>
    %9 = arith.mulf %7, %8 : vector<16x128xf32>
    %10 = vector.broadcast %6 : vector<16x1xf32> to vector<16x128xf32>
    %11 = vector.broadcast %1 : vector<1x128xf32> to vector<16x128xf32>
    %12 = arith.mulf %10, %11 : vector<16x128xf32>
    %13 = arith.addf %9, %12 : vector<16x128xf32>
    %14 = vector.broadcast %2 : vector<1x128xf32> to vector<16x128xf32>
    %15 = arith.addf %13, %14 : vector<16x128xf32>
    %cst = arith.constant 0.000000e+00 : f32
    %16 = vector.broadcast %cst : f32 to vector<16x128xf32>
    %17 = arith.maximumf %15, %16 : vector<16x128xf32>
    %18 = arith.truncf %17 : vector<16x128xf32> to vector<16x128xbf16>
    %cst_12 = arith.constant dense<0.000000e+00> : vector<16x128xf32>
    %19 = tpu.matmul %18, %3, %cst_12 {dimension_numbers = #tpu.dot_dimension_numbers<[1], [0], [0], [1], [0, 0, 1, 1], [], []>} : vector<16x128xbf16>, vector<128x128xbf16>, vector<16x128xf32> -> vector<16x128xf32>
    %cst_13 = arith.constant 0.000000e+00 : f32
    %20 = vector.broadcast %cst_13 : f32 to vector<16x128xf32>
    %21 = arith.maximumf %19, %20 : vector<16x128xf32>
    %22 = arith.truncf %21 : vector<16x128xf32> to vector<16x128xbf16>
    %cst_14 = arith.constant dense<0.000000e+00> : vector<16x8xf32>
    %23 = tpu.matmul %22, %4, %cst_14 {dimension_numbers = #tpu.dot_dimension_numbers<[1], [0], [0], [1], [0, 0, 1, 1], [], []>} : vector<16x128xbf16>, vector<128x8xbf16>, vector<16x8xf32> -> vector<16x8xf32>
    %24 = vector.extract_strided_slice %23 {offsets = [0, 0], sizes = [16, 1], strides = [1, 1]} : vector<16x8xf32> to vector<16x1xf32>
    %c0_15 = arith.constant 0 : index
    %c0_16 = arith.constant 0 : index
    %25 = vector.load %arg6[%c0_15, %c0_16] : memref<16x1xf32, #tpu.memory_space<vmem>>, vector<16x1xf32>
    tpu.vector_store %arg6[%c0_15, %c0_16], %24 {strides = array<i32>} : memref<16x1xf32, #tpu.memory_space<vmem>>, vector<16x1xf32>,
    return
  }
  func.func @transform_0(%arg0: i32) -> (i32, i32) {
    %c0_i32 = arith.constant 0 : i32
    %c0_i32_0 = arith.constant 0 : i32
    return %arg0, %c0_i32 : i32, i32
  }
  func.func @transform_1(%arg0: i32) -> (i32, i32) {
    %c0_i32 = arith.constant 0 : i32
    %c0_i32_0 = arith.constant 0 : i32
    %c0_i32_1 = arith.constant 0 : i32
    return %c0_i32, %c0_i32_0 : i32, i32
  }
  func.func @transform_2(%arg0: i32) -> (i32, i32) {
    %c0_i32 = arith.constant 0 : i32
    %c0_i32_0 = arith.constant 0 : i32
    %c0_i32_1 = arith.constant 0 : i32
    return %c0_i32, %c0_i32_0 : i32, i32
  }
  func.func @transform_3(%arg0: i32) -> (i32, i32) {
    %c0_i32 = arith.constant 0 : i32
    %c0_i32_0 = arith.constant 0 : i32
    %c0_i32_1 = arith.constant 0 : i32
    return %c0_i32, %c0_i32_0 : i32, i32
  }
  func.func @transform_4(%arg0: i32) -> (i32, i32) {
    %c0_i32 = arith.constant 0 : i32
    %c0_i32_0 = arith.constant 0 : i32
    %c0_i32_1 = arith.constant 0 : i32
    return %c0_i32, %c0_i32_0 : i32, i32
  }
  func.func @transform_5(%arg0: i32) -> (i32, i32) {
    %c0_i32 = arith.constant 0 : i32
    %c0_i32_0 = arith.constant 0 : i32
    return %arg0, %c0_i32 : i32, i32
  }
}

</mosaic_0001>

<bundles_post_ra>
// kernel: circle_model_v2_forward.1
= control target key start
LH: loop header
LB: loop body
LE: loop exit
PB: predicated region body
PF: predicated region fallthrough
CT: control target
= control target key end

     0   :  { %v389_v0 = vmov 1   ;;  %v390_v1 = vmov 0   ;;  %v391_v5 = vmov 0.0   ;;  %vm392_vm0 = vmmov 0   ;;  %s510_s0 = inlined_call_operand.vmem [shape: f32[16,2], index: 0, kind: input, shape index: {}]   ;;  %s511_s3 = inlined_call_operand.vmem [shape: bf16[128,128], index: 3, kind: input, shape index: {}]   ;;  %s512_s4 = inlined_call_operand.vmem [shape: bf16[128,8], index: 4, kind: input, shape index: {}]   ;;  %s513_s1 = inlined_call_operand.vmem [shape: f32[2,128], index: 1, kind: input, shape index: {}]   ;;  %s514_s2 = inlined_call_operand.vmem [shape: f32[1,128], index: 2, kind: input, shape index: {}]   ;;  %s515_s5 = inlined_call_operand.vmem [shape: f32[16,1], index: 5, kind: output, shape index: {}]  }
   0x1   :  { %371 = vset.pattern.permute.xlu1 %v389_v0  ;;  %370 = vset.pattern.permute.xlu0 %v390_v1  ;;  %v56_v2 = vld [vmem:[%s510_s0] sm:$0xff]  ;;  %v57_v4 = vld [vmem:[%s510_s0 + $0x8] sm:$0xff]  ;;  %v375_v7 = vld [vmem:[%s511_s3 + $0x10] sm:$0xff]   ;;  %vm282_vm1 = vcmask 7168  }
   0x2   :  { %75 = vperm.xlu1 %371, %v56_v2   ;;  %60 = vperm.xlu0 %370, %v56_v2   ;;  %v373_v3 = vld [vmem:[%s511_s3] sm:$0xff]   ;;  %v374_v6 = vld [vmem:[%s511_s3 + $0x8] sm:$0xff]   ;;  %v376_v8 = vld [vmem:[%s511_s3 + $0x18] sm:$0xff]  }
   0x3   :  { %326 = vmatprep.subr.bf16.mxu0 %v391_v5  ;;  %346 = vmatprep.subr.bf16.mxu1 %v391_v5  ;;  %v377_v9 = vld [vmem:[%s511_s3 + $0x20] sm:$0xff]   ;;  %v382_v11 = vld [vmem:[%s512_s4 + $0x8] sm:$0xff]   ;;  %v383_v13 = vld [vmem:[%s512_s4 + $0x10] sm:$0xff]  }
   0x4   :  { %327 = vmatpush3.bf16.msra.mxu0 %v373_v3  ;;  %342 = vmatprep.mubr.msk.bf16.mxu0 %vm392_vm0, %v391_v5  ;;  %v381_v10 = vld [vmem:[%s512_s4] sm:$0xff]   ;;  %v378_v12 = vld [vmem:[%s511_s3 + $0x28] sm:$0xff]   ;;  %v379_v14 = vld [vmem:[%s511_s3 + $0x30] sm:$0xff]  }
   0x5   :  { %328 = vmatprep.subr.bf16.mxu0 %v391_v5  ;;  %362 = vmatprep.mubr.msk.bf16.mxu1 %vm392_vm0, %v391_v5  ;;  %v384_v15 = vld [vmem:[%s512_s4 + $0x18] sm:$0xff]   ;;  %v385_v17 = vld [vmem:[%s512_s4 + $0x20] sm:$0xff]   ;;  %v386_v18 = vld [vmem:[%s512_s4 + $0x28] sm:$0xff]  }
   0x6   :  { %79 = vperm.xlu1 %371, %v57_v4   ;;  %65 = vperm.xlu0 %370, %v57_v4   ;;  %v380_v16 = vld [vmem:[%s511_s3 + $0x38] sm:$0xff]   ;;  %v290_v19 = vld [vmem:[%s513_s1 + $0x1] ss:$0 sm:$0xff]  ;;  %v289_v20 = vld [vmem:[%s513_s1] ss:$0 sm:$0xff] }
   0x7   :  { %347 = vmatpush3.bf16.msra.mxu1 %v381_v10  ;;  %v291_v26 = vld [vmem:[%s514_s2] ss:$0 sm:$0xff]  ;;  %v387_v37 = vld [vmem:[%s512_s4 + $0x30] sm:$0xff]   ;;  %v388_v38 = vld [vmem:[%s512_s4 + $0x38] sm:$0xff]  }
   0x8   :  { %329 = vmatpush3.bf16.msra.mxu0 %v374_v6  ;;  %348 = vmatprep.subr.bf16.mxu1 %v391_v5 }
   0x9   :  { %330 = vmatprep.subr.bf16.mxu0 %v391_v5 }
   0xa   :  { %372 = vset.pattern.permute.xlu0 %v389_v0 }
   0xb   :  { %349 = vmatpush3.bf16.msra.mxu1 %v382_v11 }
   0xc   :  { %331 = vmatpush3.bf16.msra.mxu0 %v375_v7  ;;  %350 = vmatprep.subr.bf16.mxu1 %v391_v5 }
   0xd   :  { %332 = vmatprep.subr.bf16.mxu0 %v391_v5 }
   0xf   :  { %351 = vmatpush3.bf16.msra.mxu1 %v383_v13 }
  0x10   :  { %333 = vmatpush3.bf16.msra.mxu0 %v376_v8  ;;  %352 = vmatprep.subr.bf16.mxu1 %v391_v5 }
  0x11   :  { %334 = vmatprep.subr.bf16.mxu0 %v391_v5 }
  0x13   :  { %353 = vmatpush3.bf16.msra.mxu1 %v384_v15 }
  0x14   :  { %335 = vmatpush3.bf16.msra.mxu0 %v377_v9  ;;  %354 = vmatprep.subr.bf16.mxu1 %v391_v5 }
  0x15   :  { %336 = vmatprep.subr.bf16.mxu0 %v391_v5 }
  0x17   :  { %355 = vmatpush3.bf16.msra.mxu1 %v385_v17 }
  0x18   :  { %337 = vmatpush3.bf16.msra.mxu0 %v378_v12  ;;  %356 = vmatprep.subr.bf16.mxu1 %v391_v5 }
  0x19   :  { %338 = vmatprep.subr.bf16.mxu0 %v391_v5 }
  0x1b   :  { %357 = vmatpush3.bf16.msra.mxu1 %v386_v18 }
  0x1c   :  { %339 = vmatpush3.bf16.msra.mxu0 %v379_v14  ;;  %358 = vmatprep.subr.bf16.mxu1 %v391_v5 }
  0x1d   :  { %340 = vmatprep.subr.bf16.mxu0 %v391_v5 }
  0x1f   :  { %359 = vmatpush3.bf16.msra.mxu1 %v387_v37 }
  0x20   :  { %341 = vmatpush3.bf16.msra.mxu0 %v380_v16  ;;  %360 = vmatprep.subr.bf16.mxu1 %v391_v5 }
  0x23   :  { %361 = vmatpush3.bf16.msra.mxu1 %v388_v38 }
  0x81   :  { %v76_v21 = vpop.permute.xlu1 %75  ;;  %v61_v22 = vpop.permute.xlu0 %60 }
  0x82   :  { %v86_v23 = vmul.f32 %v290_v19, %v76_v21  ;;  %v72_v24 = vmul.f32 %v289_v20, %v61_v22 }
  0x84   :  { %v88_v25 = vadd.f32 %v86_v23, %v72_v24 }
  0x85   :  { %v80_v27 = vpop.permute.xlu1 %79  ;;  %v66_v28 = vpop.permute.xlu0 %65 }
  0x86   :  { %v87_v29 = vmul.f32 %v290_v19, %v80_v27  ;;  %v73_v30 = vmul.f32 %v289_v20, %v66_v28  ;;  %v96_v31 = vadd.f32 %v291_v26, %v88_v25 }
  0x88   :  { %v89_v32 = vadd.f32 %v87_v29, %v73_v30  ;;  %v98_v34 = vmax.f32 %v96_v31, 0.0 }
  0x8a   :  { %v97_v33 = vadd.f32 %v291_v26, %v89_v32 }
  0x8c   :  { %v99_v35 = vmax.f32 %v97_v33, 0.0 }
  0x8e   :  { %v100_v36 = vpack.c.bf16 %v99_v35, %v98_v34 }
  0x90   :  { %343 = vmatmul.mubr.bf16.vlgmr.msra.gmra.mrb[0].mxu0 %v100_v36 }
 0x163   :  { %v183_v39 = vpop.f32.mrb[0].mxu0 }
 0x164   :  { %v344_v40 = vpop.f32.mrb[1].mxu0  ;;  %v190_v42 = vmax.f32 %v183_v39, 0.0 }
 0x165   :  { %v186_v41 = vpop.f32.mrb[2].mxu0 }
 0x166   :  { %v191_v43 = vmax.f32 %v186_v41, 0.0  ;;  %v345_v44 = vpop.f32.mrb[3].mxu0 }
 0x168   :  { %v192_v45 = vpack.c.bf16 %v191_v43, %v190_v42 }
 0x16a   :  { %363 = vmatmul.mubr.bf16.vlgmr.msra.gmra.mrb[0].mxu1 %v192_v45 }
 0x23d   :  { %v275_v46 = vpop.f32.mrb[0].mxu1 }
 0x23e   :  { %283 = vst.msk [vmem:[%s515_s5] sm:$0xff] %vm282_vm1, %v275_v46  ;;  %v364_v47 = vpop.f32.mrb[1].mxu1 }
 0x23f   :  { %v278_v48 = vpop.f32.mrb[2].mxu1 }
 0x240   :  { %284 = vst.msk [vmem:[%s515_s5 + $0x8] sm:$0xff] %vm282_vm1, %v278_v48  ;;  %v365_v49 = vpop.f32.mrb[3].mxu1 }

</bundles_post_ra>
